<compile_context>
chip_gen: v5e
topology: v5e:2x2
jax: 0.10.0
libtpu: 0.0.40
codegen_flags: <defaults>
</compile_context>

<pallas_src>
import functools

import jax
import jax.numpy as jnp
from jax.experimental import pallas as pl
from jax.experimental.pallas import tpu as pltpu


def _round_up(x: int, m: int) -> int:
    return (x + m - 1) // m * m


def ffn_kernel(x_ref, w0_ref, b0_ref, w1_ref, b1_ref, o_ref, acc_ref):
    """One (token-tile, d_ff-chunk) grid step of Linear0 -> ReLU -> Linear1."""
    k = pl.program_id(1)

    @pl.when(k == 0)
    def _():
        acc_ref[...] = jnp.zeros_like(acc_ref)

    # Layer 0 chunk: x @ W0[:, chunk] + b0[chunk], then ReLU.
    # (dropout p=0 between layer0 and the activation is an identity)
    h = jnp.dot(x_ref[...], w0_ref[...], preferred_element_type=jnp.float32)
    h = jnp.maximum(h + b0_ref[...], 0.0)

    # Layer 1 partial: accumulate h_chunk @ W1[chunk, :] in f32.
    acc_ref[...] += jnp.dot(h.astype(w1_ref.dtype), w1_ref[...],
                            preferred_element_type=jnp.float32)

    @pl.when(k == pl.num_programs(1) - 1)
    def _():
        # Final bias add (dropout_2 p=0 == identity) and cast to output dtype.
        o_ref[...] = (acc_ref[...] + b1_ref[...]).astype(o_ref.dtype)


def positionwise_feedforward(x, w0, b0, w1, b1, *,
                             tile_m: int = 256,
                             tile_f: int = 512,
                             compute_dtype=None):
    """x: (B, S, d_model); w0: (d_model, d_ff); w1: (d_ff, d_model).

    compute_dtype: optional MXU operand dtype (e.g. jnp.bfloat16 on v6e/v7x);
    accumulation and bias adds stay in f32 regardless.
    """
    B, S, d_model = x.shape
    d_ff = w0.shape[1]
    assert w0.shape == (d_model, d_ff)
    assert b0.shape == (d_ff,)
    assert w1.shape == (d_ff, d_model)
    assert b1.shape == (d_model,)

    out_dtype = x.dtype
    cdt = x.dtype if compute_dtype is None else compute_dtype
    c_itemsize = jnp.dtype(cdt).itemsize
    o_itemsize = jnp.dtype(out_dtype).itemsize

    M = B * S

    # ---- tile / padding selection -------------------------------------------------
    # Feature (lane) dims: >=128 and multiples of 128 for unmasked stores / full MXU.
    d_model_p = max(128, _round_up(d_model, 128))
    tile_f = max(128, _round_up(min(tile_f, _round_up(d_ff, 128)), 128))
    d_ff_p = _round_up(d_ff, tile_f)
    # Token (sublane) dim: multiple of 8.
    tile_m = max(8, _round_up(min(tile_m, _round_up(M, 8)), 8))
    M_p = _round_up(M, tile_m)

    grid = (M_p // tile_m, d_ff_p // tile_f)

    # ---- operand preparation (zero padding is exact, see header comment) ----------
    x2d = jnp.pad(x.reshape(M, d_model).astype(cdt),
                  ((0, M_p - M), (0, d_model_p - d_model)))
    w0p = jnp.pad(w0.astype(cdt),
                  ((0, d_model_p - d_model), (0, d_ff_p - d_ff)))
    w1p = jnp.pad(w1.astype(cdt),
                  ((0, d_ff_p - d_ff), (0, d_model_p - d_model)))
    # Biases stay f32: they are added to the f32 accumulator / f32 hidden.
    b0p = jnp.pad(b0.astype(jnp.float32), (0, d_ff_p - d_ff)).reshape(1, d_ff_p)
    b1p = jnp.pad(b1.astype(jnp.float32),
                  (0, d_model_p - d_model)).reshape(1, d_model_p)

    # ---- VMEM budget: double-buffered blocks + accumulator scratch + headroom -----
    vmem_needed = (
        2 * tile_m * d_model_p * c_itemsize          # x tile
        + 2 * d_model_p * tile_f * c_itemsize        # W0 slice
        + 2 * tile_f * d_model_p * c_itemsize        # W1 slice
        + 2 * tile_f * 4 + 2 * d_model_p * 4         # b0 / b1 slices (f32)
        + 2 * tile_m * d_model_p * o_itemsize        # output tile
        + tile_m * d_model_p * 4                     # f32 accumulator scratch
    )
    vmem_limit = int(min(max(vmem_needed + (8 << 20), 16 << 20), 64 << 20))

    cost = pl.CostEstimate(
        flops=4 * M_p * d_model_p * d_ff_p,          # two matmuls
        transcendentals=0,
        bytes_accessed=(x2d.size * c_itemsize + w0p.size * c_itemsize
                        + w1p.size * c_itemsize + b0p.size * 4 + b1p.size * 4
                        + M_p * d_model_p * o_itemsize),
    )

    out2d = pl.pallas_call(
        ffn_kernel,
        out_shape=jax.ShapeDtypeStruct((M_p, d_model_p), out_dtype),
        grid_spec=pltpu.PrefetchScalarGridSpec(
            num_scalar_prefetch=0,
            grid=grid,
            in_specs=[
                pl.BlockSpec((tile_m, d_model_p), lambda i, k: (i, 0)),   # x tile
                pl.BlockSpec((d_model_p, tile_f), lambda i, k: (0, k)),   # W0 slice
                pl.BlockSpec((1, tile_f), lambda i, k: (0, k)),           # b0 slice
                pl.BlockSpec((tile_f, d_model_p), lambda i, k: (k, 0)),   # W1 slice
                pl.BlockSpec((1, d_model_p), lambda i, k: (0, 0)),        # b1
            ],
            out_specs=pl.BlockSpec((tile_m, d_model_p), lambda i, k: (i, 0)),
            scratch_shapes=[pltpu.VMEM((tile_m, d_model_p), jnp.float32)],
        ),
        compiler_params=pltpu.CompilerParams(
            dimension_semantics=("parallel", "arbitrary"),
            vmem_limit_bytes=vmem_limit,
        ),
        cost_estimate=cost,
    )(x2d, w0p, b0p, w1p, b1p)

    return out2d[:M, :d_model].reshape(B, S, d_model)


def reference_ffn(x, w0, b0, w1, b1):
    h = jnp.dot(x, w0) + b0
    h = jnp.maximum(h, 0.0)
    return jnp.dot(h, w1) + b1


if __name__ == "__main__":
    # sizes = [d_model, d_ff, d_model] -> two Linear layers, ReLU between,
    # dropout=None -> p=0 identity.
    B, S = 2, 8
    d_model, d_ff = 32, 192     # small shapes; d_ff pads to 256 -> 2 reduction steps

    key = jax.random.PRNGKey(0)
    kx, k0w, k0b, k1w, k1b = jax.random.split(key, 5)

    x = jax.random.normal(kx, (B, S, d_model), dtype=jnp.float32)

    # PyTorch nn.Linear-style uniform init bounds; weights stored (in, out)
    # so the kernel computes x @ W.
    bound0 = 1.0 / (d_model ** 0.5)
    w0 = jax.random.uniform(k0w, (d_model, d_ff), jnp.float32, -bound0, bound0)
    b0 = jax.random.uniform(k0b, (d_ff,), jnp.float32, -bound0, bound0)
    bound1 = 1.0 / (d_ff ** 0.5)
    w1 = jax.random.uniform(k1w, (d_ff, d_model), jnp.float32, -bound1, bound1)
    b1 = jax.random.uniform(k1b, (d_model,), jnp.float32, -bound1, bound1)

    # tile_m=8 -> 2 token tiles (pipelined, "parallel"); tile_f=128 with
    # d_ff padded to 256 -> 2 accumulation steps ("arbitrary", last axis).
    ffn = jax.jit(functools.partial(positionwise_feedforward,
                                    tile_m=8, tile_f=128))
    out = jax.block_until_ready(ffn(x, w0, b0, w1, b1))

    ref = reference_ffn(x, w0, b0, w1, b1)
    assert out.shape == (B, S, d_model)
    assert jnp.allclose(out, ref, atol=1e-4, rtol=1e-4), (
        float(jnp.max(jnp.abs(out - ref))))

    print("KERNEL_OK")
</pallas_src>

<mosaic_0001>
module attributes {stable_mosaic.version = 11 : i64} {
  func.func @ffn_kernel(%arg0: i32, %arg1: i32, %arg2: memref<8x128xf32, #tpu.memory_space<vmem>>, %arg3: memref<128x128xf32, #tpu.memory_space<vmem>>, %arg4: memref<1x128xf32, #tpu.memory_space<vmem>>, %arg5: memref<128x128xf32, #tpu.memory_space<vmem>>, %arg6: memref<1x128xf32, #tpu.memory_space<vmem>>, %arg7: memref<8x128xf32, #tpu.memory_space<vmem>>, %arg8: memref<8x128xf32, #tpu.memory_space<vmem>>) attributes {dimension_semantics = [#tpu.dimension_semantics<parallel>, #tpu.dimension_semantics<arbitrary>], iteration_bounds = array<i64: 2, 2>, scalar_prefetch = 0 : i64, scratch_operands = 1 : i64, tpu.core_type = #tpu.core_type<tc>, window_params = [{transform_indices = @transform_0, window_bounds = array<i64: 8, 128>}, {transform_indices = @transform_1, window_bounds = array<i64: 128, 128>}, {transform_indices = @transform_2, window_bounds = array<i64: 1, 128>}, {transform_indices = @transform_3, window_bounds = array<i64: 128, 128>}, {pipeline_mode = #tpu.pipeline_mode<synchronous>, transform_indices = @transform_4, window_bounds = array<i64: 1, 128>}, {transform_indices = @transform_5, window_bounds = array<i64: 8, 128>}]} {
    %c0_i32 = arith.constant 0 : i32
    %0 = arith.cmpi eq, %arg1, %c0_i32 : i32
    %1 = arith.extui %0 : i1 to i32
    %c0_i32_0 = arith.constant 0 : i32
    %2 = arith.cmpi ne, %1, %c0_i32_0 : i32
    scf.if %2 {
      %cst_15 = arith.constant 0.000000e+00 : f32
      %19 = vector.broadcast %cst_15 : f32 to vector<8x128xf32>
      %c0_16 = arith.constant 0 : index
      %c0_17 = arith.constant 0 : index
      %20 = vector.load %arg8[%c0_16, %c0_17] : memref<8x128xf32, #tpu.memory_space<vmem>>, vector<8x128xf32>
      tpu.vector_store %arg8[%c0_16, %c0_17], %19 {strides = array<i32>} : memref<8x128xf32, #tpu.memory_space<vmem>>, vector<8x128xf32>,
    } else {
    }
    %c0 = arith.constant 0 : index
    %c0_1 = arith.constant 0 : index
    %3 = vector.load %arg2[%c0, %c0_1] : memref<8x128xf32, #tpu.memory_space<vmem>>, vector<8x128xf32>
    %c0_2 = arith.constant 0 : index
    %c0_3 = arith.constant 0 : index
    %4 = vector.load %arg3[%c0_2, %c0_3] : memref<128x128xf32, #tpu.memory_space<vmem>>, vector<128x128xf32>
    %cst = arith.constant dense<0.000000e+00> : vector<8x128xf32>
    %5 = tpu.matmul %3, %4, %cst {dimension_numbers = #tpu.dot_dimension_numbers<[1], [0], [0], [1], [0, 0, 1, 1], [], []>} : vector<8x128xf32>, vector<128x128xf32>, vector<8x128xf32> -> vector<8x128xf32>
    %c0_4 = arith.constant 0 : index
    %c0_5 = arith.constant 0 : index
    %6 = vector.load %arg4[%c0_4, %c0_5] : memref<1x128xf32, #tpu.memory_space<vmem>>, vector<1x128xf32>
    %7 = vector.broadcast %6 : vector<1x128xf32> to vector<8x128xf32>
    %8 = arith.addf %5, %7 : vector<8x128xf32>
    %cst_6 = arith.constant 0.000000e+00 : f32
    %9 = vector.broadcast %cst_6 : f32 to vector<8x128xf32>
    %10 = arith.maximumf %8, %9 : vector<8x128xf32>
    %c0_7 = arith.constant 0 : index
    %c0_8 = arith.constant 0 : index
    %11 = vector.load %arg8[%c0_7, %c0_8] : memref<8x128xf32, #tpu.memory_space<vmem>>, vector<8x128xf32>
    %c0_9 = arith.constant 0 : index
    %c0_10 = arith.constant 0 : index
    %12 = vector.load %arg5[%c0_9, %c0_10] : memref<128x128xf32, #tpu.memory_space<vmem>>, vector<128x128xf32>
    %cst_11 = arith.constant dense<0.000000e+00> : vector<8x128xf32>
    %13 = tpu.matmul %10, %12, %cst_11 {dimension_numbers = #tpu.dot_dimension_numbers<[1], [0], [0], [1], [0, 0, 1, 1], [], []>} : vector<8x128xf32>, vector<128x128xf32>, vector<8x128xf32> -> vector<8x128xf32>
    %14 = arith.addf %11, %13 : vector<8x128xf32>
    %c0_12 = arith.constant 0 : index
    %c0_13 = arith.constant 0 : index
    %15 = vector.load %arg8[%c0_12, %c0_13] : memref<8x128xf32, #tpu.memory_space<vmem>>, vector<8x128xf32>
    tpu.vector_store %arg8[%c0_12, %c0_13], %14 {strides = array<i32>} : memref<8x128xf32, #tpu.memory_space<vmem>>, vector<8x128xf32>,
    %c1_i32 = arith.constant 1 : i32
    %16 = arith.cmpi eq, %arg1, %c1_i32 : i32
    %17 = arith.extui %16 : i1 to i32
    %c0_i32_14 = arith.constant 0 : i32
    %18 = arith.cmpi ne, %17, %c0_i32_14 : i32
    scf.if %18 {
      %c0_15 = arith.constant 0 : index
      %c0_16 = arith.constant 0 : index
      %19 = vector.load %arg8[%c0_15, %c0_16] : memref<8x128xf32, #tpu.memory_space<vmem>>, vector<8x128xf32>
      %c0_17 = arith.constant 0 : index
      %c0_18 = arith.constant 0 : index
      %20 = vector.load %arg6[%c0_17, %c0_18] : memref<1x128xf32, #tpu.memory_space<vmem>>, vector<1x128xf32>
      %21 = vector.broadcast %20 : vector<1x128xf32> to vector<8x128xf32>
      %22 = arith.addf %19, %21 : vector<8x128xf32>
      %c0_19 = arith.constant 0 : index
      %c0_20 = arith.constant 0 : index
      %23 = vector.load %arg7[%c0_19, %c0_20] : memref<8x128xf32, #tpu.memory_space<vmem>>, vector<8x128xf32>
      tpu.vector_store %arg7[%c0_19, %c0_20], %22 {strides = array<i32>} : memref<8x128xf32, #tpu.memory_space<vmem>>, vector<8x128xf32>,
    } else {
    }
    return
  }
  func.func @transform_0(%arg0: i32, %arg1: i32) -> (i32, i32) {
    %c0_i32 = arith.constant 0 : i32
    %c0_i32_0 = arith.constant 0 : i32
    return %arg0, %c0_i32 : i32, i32
  }
  func.func @transform_1(%arg0: i32, %arg1: i32) -> (i32, i32) {
    %c0_i32 = arith.constant 0 : i32
    %c0_i32_0 = arith.constant 0 : i32
    return %c0_i32, %arg1 : i32, i32
  }
  func.func @transform_2(%arg0: i32, %arg1: i32) -> (i32, i32) {
    %c0_i32 = arith.constant 0 : i32
    %c0_i32_0 = arith.constant 0 : i32
    return %c0_i32, %arg1 : i32, i32
  }
  func.func @transform_3(%arg0: i32, %arg1: i32) -> (i32, i32) {
    %c0_i32 = arith.constant 0 : i32
    %c0_i32_0 = arith.constant 0 : i32
    return %arg1, %c0_i32 : i32, i32
  }
  func.func @transform_4(%arg0: i32, %arg1: i32) -> (i32, i32) {
    %c0_i32 = arith.constant 0 : i32
    %c0_i32_0 = arith.constant 0 : i32
    %c0_i32_1 = arith.constant 0 : i32
    return %c0_i32, %c0_i32_0 : i32, i32
  }
  func.func @transform_5(%arg0: i32, %arg1: i32) -> (i32, i32) {
    %c0_i32 = arith.constant 0 : i32
    %c0_i32_0 = arith.constant 0 : i32
    return %arg0, %c0_i32 : i32, i32
  }
}

</mosaic_0001>

<bundles_post_ra>
// kernel: positionwise_feedforward.1
= control target key start
LH: loop header
LB: loop body
LE: loop exit
PB: predicated region body
PF: predicated region fallthrough
CT: control target
= control target key end

     0   :  { %s916_s0 = inlined_call_operand.vmem [shape: f32[16,128], index: 0, kind: input, shape index: {}]   ;;  %s917_s1 = inlined_call_operand.vmem [shape: f32[128,256], index: 1, kind: input, shape index: {}]   ;;  %s918_s2 = inlined_call_operand.vmem [shape: f32[1,256], index: 2, kind: input, shape index: {}]   ;;  %s919_s3 = inlined_call_operand.vmem [shape: f32[256,128], index: 3, kind: input, shape index: {}]   ;;  %s920_s4 = inlined_call_operand.vmem [shape: f32[1,128], index: 4, kind: input, shape index: {}]   ;;  %s921_s5 = inlined_call_operand.vmem [shape: f32[16,128], index: 5, kind: output, shape index: {}]  }
   0x1   :  { %922 = sst [smem:[#allocation4_spill]] %s917_s1 }
   0x2   :  { %s745_s18 = smov 0   ;;  %s747_s19 = smov 0  }
   0x3   :  { %s749_s20 = smov 0   ;;  %s751_s21 = smov 0  }
   0x4   :  { %s753_s22 = smov 0   ;;  %s755_s23 = smov 0  }
   0x5   :  { %s757_s24 = smov 0  }
   0x6 LB: > { %s24_s25 = sadd.s32 1, %s704_s22  ;;  %s27_s26 = sadd.s32 1, %s708_s23  ;;  %s712_s24 = sphi %s757_s24, %s15_s24   ;;  %s708_s23 = sphi %s755_s23, %s929_s23   ;;  %s704_s22 = sphi %s753_s22, %s928_s22   ;;  %s700_s21 = sphi %s751_s21, %s927_s21   ;;  %s696_s20 = sphi %s749_s20, %s926_s20   ;;  %s692_s19 = sphi %s747_s19, %s925_s19   ;;  %s688_s18 = sphi %s745_s18, %s924_s18  }
   0x7   : > { %p25_p0 = scmp.ge.s32.totalorder %s24_s25, 2  ;;  %s60_s27 = sadd.s32 1, %s692_s19 }
   0x8   : > { %p67_p1 = scmp.ne.s32.totalorder %s692_s19, %s688_s18  ;;  %p68_p2 = scmp.eq.s32.totalorder %s712_s24, 0 }
   0x9   : > { %s931_s25 = smov (%p25_p0, %s24_s25), 0  ;;  %s933_s26 = smov (!%p25_p0, %s27_s26), %s708_s23 }
   0xa   : > { %s57_s28 = ssub.s32 %s704_s22, %s931_s25  ;;  %p69_p3 = por %p68_p2, %p67_p1 }
   0xb   : > { %p29_p4 = scmp.ge.s32.totalorder %s933_s26, 2  ;;  %p58_p5 = scmp.eq.s32.totalorder %s57_s28, 0 }
   0xc   : > { %p586_p6 = scmp.ge.s32.totalorder %s712_s24, 4 }
   0xd   : > { %s935_s26 = smov (%p29_p4, %s933_s26), 0 }
   0xe   : > { %s794_s29 = scalar_select %p58_p5, %s692_s19, %s60_s27  }
   0xf   : > { %195 = sbr.rel (%p586_p6) target bundleno = 46 (0x2e), region = 20 }
  0x14   : > { %205 = sbr.rel (!%p69_p3) target bundleno = 46 (0x2e), region = 28  ;;  %s207_s30 = sand.u32 (%p69_p3), 1, %s692_s19  }
  0x15   : > { %s588_s6 = sshll.u32 (%p69_p3), %s704_s22, 3  ;;  %s587_s7 = sshll.u32 (%p69_p3), %s207_s30, 7 }
  0x16   : > { %s923_s1 = sld [smem:[#allocation4_spill]] (%p69_p3)  ;;  %s209_s11 = scalar_lea.vmem (%p69_p3), [#allocation3], %s587_s7 }
  0x1c   : > { %s802_s10 = scalar_lea.vmem %s923_s1, %s588_s6 }
  0x1d   : > { %v270_v0 = vld [vmem:[%s802_s10] sm:$0xff]  ;;  %v272_v1 = vld [vmem:[%s802_s10 + $0x10] sm:$0xff] }
  0x1e   : > { %v274_v2 = vld [vmem:[%s802_s10 + $0x20] sm:$0xff]  ;;  %271 = vst [vmem:[%s209_s11] sm:$0xff] %v270_v0  ;;  %v276_v3 = vld [vmem:[%s802_s10 + $0x30] sm:$0xff] }
  0x1f   : > { %273 = vst [vmem:[%s209_s11 + $0x8] sm:$0xff] %v272_v1  ;;  %v278_v4 = vld [vmem:[%s802_s10 + $0x40] sm:$0xff]  ;;  %v280_v5 = vld [vmem:[%s802_s10 + $0x50] sm:$0xff] }
  0x20   : > { %275 = vst [vmem:[%s209_s11 + $0x10] sm:$0xff] %v274_v2  ;;  %v282_v6 = vld [vmem:[%s802_s10 + $0x60] sm:$0xff]  ;;  %v284_v7 = vld [vmem:[%s802_s10 + $0x70] sm:$0xff] }
  0x21   : > { %277 = vst [vmem:[%s209_s11 + $0x18] sm:$0xff] %v276_v3  ;;  %v286_v8 = vld [vmem:[%s802_s10 + $0x80] sm:$0xff]  ;;  %v288_v9 = vld [vmem:[%s802_s10 + $0x90] sm:$0xff] }
  0x22   : > { %279 = vst [vmem:[%s209_s11 + $0x20] sm:$0xff] %v278_v4  ;;  %v290_v10 = vld [vmem:[%s802_s10 + $0xa0] sm:$0xff]  ;;  %v292_v11 = vld [vmem:[%s802_s10 + $0xb0] sm:$0xff] }
  0x23   : > { %281 = vst [vmem:[%s209_s11 + $0x28] sm:$0xff] %v280_v5  ;;  %v294_v12 = vld [vmem:[%s802_s10 + $0xc0] sm:$0xff]  ;;  %v296_v13 = vld [vmem:[%s802_s10 + $0xd0] sm:$0xff] }
  0x24   : > { %283 = vst [vmem:[%s209_s11 + $0x30] sm:$0xff] %v282_v6  ;;  %v298_v14 = vld [vmem:[%s802_s10 + $0xe0] sm:$0xff]  ;;  %v300_v15 = vld [vmem:[%s802_s10 + $0xf0] sm:$0xff] }
  0x25   : > { %285 = vst [vmem:[%s209_s11 + $0x38] sm:$0xff] %v284_v7 }
  0x26   : > { %287 = vst [vmem:[%s209_s11 + $0x40] sm:$0xff] %v286_v8 }
  0x27   : > { %289 = vst [vmem:[%s209_s11 + $0x48] sm:$0xff] %v288_v9 }
  0x28   : > { %291 = vst [vmem:[%s209_s11 + $0x50] sm:$0xff] %v290_v10 }
  0x29   : > { %293 = vst [vmem:[%s209_s11 + $0x58] sm:$0xff] %v292_v11 }
  0x2a   : > { %295 = vst [vmem:[%s209_s11 + $0x60] sm:$0xff] %v294_v12 }
  0x2b   : > { %297 = vst [vmem:[%s209_s11 + $0x68] sm:$0xff] %v296_v13 }
  0x2c   : > { %299 = vst [vmem:[%s209_s11 + $0x70] sm:$0xff] %v298_v14 }
  0x2d   : > { %301 = vst [vmem:[%s209_s11 + $0x78] sm:$0xff] %v300_v15 }
  0x2e PF: > { %p589_p7 = scmp.ge.s32.totalorder %s712_s24, 1  ;;  %p321_p8 = scmp.lt.s32.totalorder %s712_s24, 5 }
  0x30   : > { %p322_p9 = pnand %p589_p7, %p321_p8 }
  0x31   : > { %s328_s12 = sand.u32 (!%p322_p9), 1, %s688_s18   ;;  %p366_p10 = scmp.lt.s32.totalorder (!%p322_p9), %s700_s21, 1 }
  0x32   : > { %325 = sbr.rel (%p322_p9) target bundleno = 368 (0x170), region = 74  ;;  %s590_s13 = sshll.u32 (!%p322_p9), %s328_s12, 7 }
  0x33   : > { %p370_p11 = scmp.lt.s32.totalorder (!%p322_p9), %s696_s20, 1  ;;  %s592_s14 = sshll.u32 (!%p322_p9), %s696_s20, 4 }
  0x34   : > { %p374_p12 = scmp.lt.s32.totalorder (!%p322_p9), %s592_s14, 31  ;;  %s849_s1 = scalar_lea.vmem (!%p322_p9), [#allocation3], %s590_s13 }
  0x35   : > { %p595_p13 = scmp.ne.s32.totalorder (!%p322_p9), %s696_s20, 0 }
  0x37   : > { %s937_s21 = smov (!%p366_p10, %s700_s21), 1  ;;  %s939_s14 = smov (!%p374_p12, %s592_s14), 31 }
  0x38   : > { %s828_s15 = scalar_select %p370_p11, %s696_s20, 1 }
  0x39   : > { %s591_s16 = sshll.u32 %s937_s21, 3  ;;  %s593_s10 = sshll.u32 %s939_s14, 3 }
  0x3a   : > { %s833_s28 = scalar_lea.vmem %s916_s0, %s591_s16  ;;  %s372_s7 = scalar_lea.vmem %s918_s2, %s828_s15 }
  0x3b   : > { %s842_s9 = scalar_lea.vmem %s921_s5, %s591_s16  ;;  %s847_s21 = scalar_lea.vmem %s919_s3, %s593_s10 }
  0x3c   : > { %386 = sbr.rel (%p595_p13) target bundleno = 67 (0x43), region = 82 }
  0x41   : > { %v714_v16 = vmov 0.0  }
  0x42   : > { %387 = vst [vmem:[#allocation2] sm:$0xff] %v714_v16 }
  0x43 PF: > { %v404_v17 = vld [vmem:[%s849_s1 + $0x78] sm:$0xff]  ;;  %v403_v18 = vld [vmem:[%s849_s1 + $0x70] sm:$0xff]  ;;  %v402_v19 = vld [vmem:[%s849_s1 + $0x68] sm:$0xff]  ;;  %p596_p0 = scmp.ne.s32.totalorder %s696_s20, 1 }
  0x44   : > { %409 = vmatpush.msra.mxu0 %v404_v17  ;;  %v401_v20 = vld [vmem:[%s849_s1 + $0x60] sm:$0xff]  ;;  %v446_v21 = vld [vmem:[%s847_s21 + $0x78] sm:$0xff]  ;;  %v400_v22 = vld [vmem:[%s849_s1 + $0x58] sm:$0xff] }
  0x45   : > { %447 = vmatpush.msra.mxu1 %v446_v21  ;;  %v445_v23 = vld [vmem:[%s847_s21 + $0x70] sm:$0xff]  ;;  %v444_v24 = vld [vmem:[%s847_s21 + $0x68] sm:$0xff]  ;;  %v399_v25 = vld [vmem:[%s849_s1 + $0x50] sm:$0xff] }
  0x46   : > { %410 = vmatpush.msra.mxu0 %v403_v18  ;;  %v443_v26 = vld [vmem:[%s847_s21 + $0x60] sm:$0xff]  ;;  %v398_v27 = vld [vmem:[%s849_s1 + $0x48] sm:$0xff]  ;;  %v442_v28 = vld [vmem:[%s847_s21 + $0x58] sm:$0xff] }
  0x47   : > { %448 = vmatpush.msra.mxu1 %v445_v23  ;;  %v397_v29 = vld [vmem:[%s849_s1 + $0x40] sm:$0xff]  ;;  %v441_v30 = vld [vmem:[%s847_s21 + $0x50] sm:$0xff]  ;;  %v396_v31 = vld [vmem:[%s849_s1 + $0x38] sm:$0xff] }
  0x48   : > { %411 = vmatpush.msra.mxu0 %v402_v19  ;;  %v440_v32 = vld [vmem:[%s847_s21 + $0x48] sm:$0xff]  ;;  %v395_v33 = vld [vmem:[%s849_s1 + $0x30] sm:$0xff]  ;;  %v439_v34 = vld [vmem:[%s847_s21 + $0x40] sm:$0xff] }
  0x49   : > { %449 = vmatpush.msra.mxu1 %v444_v24  ;;  %v394_v35 = vld [vmem:[%s849_s1 + $0x28] sm:$0xff]  ;;  %v438_v36 = vld [vmem:[%s847_s21 + $0x38] sm:$0xff]  ;;  %v393_v37 = vld [vmem:[%s849_s1 + $0x20] sm:$0xff] }
  0x4a   : > { %412 = vmatpush.msra.mxu0 %v401_v20  ;;  %v437_v38 = vld [vmem:[%s847_s21 + $0x30] sm:$0xff]  ;;  %v392_v39 = vld [vmem:[%s849_s1 + $0x18] sm:$0xff]  ;;  %v436_v40 = vld [vmem:[%s847_s21 + $0x28] sm:$0xff] }
  0x4b   : > { %450 = vmatpush.msra.mxu1 %v443_v26  ;;  %v391_v41 = vld [vmem:[%s849_s1 + $0x10] sm:$0xff]  ;;  %v435_v42 = vld [vmem:[%s847_s21 + $0x20] sm:$0xff]  ;;  %v390_v43 = vld [vmem:[%s849_s1 + $0x8] sm:$0xff] }
  0x4c   : > { %413 = vmatpush.msra.mxu0 %v400_v22  ;;  %v434_v44 = vld [vmem:[%s847_s21 + $0x18] sm:$0xff]  ;;  %v389_v45 = vld [vmem:[%s849_s1] sm:$0xff]  ;;  %v388_v46 = vld [vmem:[%s833_s28] sm:$0xff] }
  0x4d   : > { %451 = vmatpush.msra.mxu1 %v442_v28  ;;  %v433_v47 = vld [vmem:[%s847_s21 + $0x10] sm:$0xff]  ;;  %v432_v48 = vld [vmem:[%s847_s21 + $0x8] sm:$0xff]  ;;  %v431_v49 = vld [vmem:[%s847_s21] sm:$0xff] }
  0x4e   : > { %414 = vmatpush.msra.mxu0 %v399_v25  ;;  %v656_v50 = vld [vmem:[%s372_s7] ss:$0 sm:$0xff] }
  0x4f   : > { %452 = vmatpush.msra.mxu1 %v441_v30  ;;  %v430_v54 = vld [vmem:[#allocation2] sm:$0xff] }
  0x50   : > { %415 = vmatpush.msra.mxu0 %v398_v27 }
  0x51   : > { %453 = vmatpush.msra.mxu1 %v440_v32 }
  0x52   : > { %416 = vmatpush.msra.mxu0 %v397_v29 }
  0x53   : > { %454 = vmatpush.msra.mxu1 %v439_v34 }
  0x54   : > { %417 = vmatpush.msra.mxu0 %v396_v31 }
  0x55   : > { %455 = vmatpush.msra.mxu1 %v438_v36 }
  0x56   : > { %418 = vmatpush.msra.mxu0 %v395_v33 }
  0x57   : > { %456 = vmatpush.msra.mxu1 %v437_v38 }
  0x58   : > { %419 = vmatpush.msra.mxu0 %v394_v35 }
  0x59   : > { %457 = vmatpush.msra.mxu1 %v436_v40 }
  0x5a   : > { %420 = vmatpush.msra.mxu0 %v393_v37 }
  0x5b   : > { %458 = vmatpush.msra.mxu1 %v435_v42 }
  0x5c   : > { %421 = vmatpush.msra.mxu0 %v392_v39 }
  0x5d   : > { %459 = vmatpush.msra.mxu1 %v434_v44 }
  0x5e   : > { %422 = vmatpush.msra.mxu0 %v391_v41 }
  0x5f   : > { %460 = vmatpush.msra.mxu1 %v433_v47 }
  0x60   : > { %423 = vmatpush.msra.mxu0 %v390_v43 }
  0x61   : > { %461 = vmatpush.msra.mxu1 %v432_v48 }
  0x62   : > { %424 = vmatpush.msra.mxu0 %v389_v45 }
  0x63   : > { %425 = vmatmul.f32.vlgmr.msra.gmra.mxu0 %v388_v46  ;;  %462 = vmatpush.msra.mxu1 %v431_v49 }
  0xe0   : > { %v426_v51 = vpop.f32.mrf.mxu0 }
  0xe1   : > { %v427_v52 = vadd.f32 %v656_v50, %v426_v51 }
  0xe3   : > { %v429_v53 = vmax.f32 %v427_v52, 0.0 }
  0xe5   : > { %463 = vmatmul.f32.vlgmr.msra.gmra.mxu1 %v429_v53 }
 0x161   : > { %472 = sbr.rel (%p596_p0) target bundleno = 368 (0x170), region = 86 }
 0x162   : > { %v464_v55 = vpop.f32.mrf.mxu1 }
 0x163   : > { %v467_v56 = vadd.f32 %v464_v55, %v430_v54 }
 0x165   : > { %468 = vst [vmem:[#allocation2] sm:$0xff] %v467_v56 }
 0x166   : > { %v657_v58 = vld [vmem:[%s920_s4] ss:$0 sm:$0xff] }
 0x16c   : > { %v473_v57 = vld [vmem:[#allocation2] sm:$0xff] }
 0x16d   : > { %v478_v59 = vadd.f32 %v657_v58, %v473_v57 }
 0x16f   : > { %479 = vst [vmem:[%s842_s9] sm:$0xff] %v478_v59 }
 0x170 PF: > { %s15_s24 = sadd.s32 1, %s712_s24   ;;  %s924_s18 = smov %s692_s19 }
 0x171   : > { %p12_p1 = scmp.ge.s32.totalorder %s15_s24, 6   ;;  %s925_s19 = smov %s794_s29 }
 0x172   : > { %s926_s20 = smov %s704_s22  ;;  %s927_s21 = smov %s708_s23 }
 0x173   : > { %s928_s22 = smov %s931_s25  ;;  %s929_s23 = smov %s935_s26 }
 0x174   :  { %14 = sbr.rel (!%p12_p1) target bundleno = 6 (0x6), region = 130 }

</bundles_post_ra>
